<compile_context>
chip_gen: v6e
topology: v6e:2x2x1
jax: 0.10.0
libtpu: 0.0.40
codegen_flags: <defaults>
</compile_context>

<pallas_src>
import functools

import jax
import jax.numpy as jnp
from jax.experimental import pallas as pl
from jax.experimental.pallas import tpu as pltpu

NEG_SLOPE = 0.01          # nn.LeakyReLU() default
IN_F = 49
HID_F = 7
OUT_F = 25
DEFAULT_TILE_B = 8192     # ~16 MiB of double-buffered lane-padded VMEM per call
_VMEM_LIMIT = 32 * 1024 * 1024


def _round_up(n: int, m: int) -> int:
    return ((n + m - 1) // m) * m


def _fwd_stats_kernel(x_ref, w1_ref, b1_ref, w2_ref, b2_ref,
                      y_ref, m_ref, l_ref, *, batch):
    """Fused Linear->LeakyReLU->Linear (both matmuls on the MXU) plus online
    dim-0 softmax statistics accumulated in resident (1, 25) output blocks."""
    i = pl.program_id(0)
    tb = x_ref.shape[0]

    @pl.when(i == 0)
    def _init():
        m_ref[...] = jnp.full_like(m_ref, -jnp.inf)
        l_ref[...] = jnp.zeros_like(l_ref)

    x = x_ref[...]                                                   # (tb, 49)

    # Layer 1 on the MXU, f32 accumulation.
    h = jnp.dot(x, w1_ref[...], preferred_element_type=jnp.float32) + b1_ref[...]
    # LeakyReLU (negative_slope = 0.01): one compare + one select on the VPU.
    h = jnp.where(h >= 0, h, NEG_SLOPE * h)                          # (tb, 7)
    # Layer 2 also on the MXU (was a lane-sparse VPU MAC loop before).
    y = jnp.dot(h, w2_ref[...], preferred_element_type=jnp.float32) + b2_ref[...]
    y_ref[...] = y                                                   # (tb, 25)

    # Online dim-0 (batch-axis) softmax stats; mask rows past the real batch
    # (partial last block) so they contribute nothing.
    rows = jax.lax.broadcasted_iota(jnp.int32, (tb, 1), 0)
    valid = (i * tb + rows) < batch
    y_m = jnp.where(valid, y, -jnp.inf)

    m_prev = m_ref[...]                                              # (1, 25)
    l_prev = l_ref[...]                                              # (1, 25)
    m_new = jnp.maximum(m_prev, jnp.max(y_m, axis=0, keepdims=True))
    p = jnp.exp(y_m - m_new)                                         # invalid rows -> 0
    l_new = l_prev * jnp.exp(m_prev - m_new) + jnp.sum(p, axis=0, keepdims=True)
    m_ref[...] = m_new
    l_ref[...] = l_new


def _normalize_kernel(y_ref, m_ref, l_ref, o_ref):
    """Tiled normalize: softmax(dim=0) given global column max / sum-exp."""
    e = jnp.exp(y_ref[...] - m_ref[...])
    # Exact reciprocal of the (1, 25) denom, broadcast multiply (no per-row div).
    o_ref[...] = e * pl.reciprocal(l_ref[...])


def prepare_params(w1, b1, w2, b2):
    """One-time prep: weights transposed to (in, out), biases lifted to 2-D."""
    return (w1.T.astype(jnp.float32),               # (49, 7)
            b1.reshape(1, -1).astype(jnp.float32),  # (1, 7)
            w2.T.astype(jnp.float32),               # (7, 25)
            b2.reshape(1, -1).astype(jnp.float32))  # (1, 25)


@functools.partial(jax.jit, static_argnames=("tile_b",))
def transduction_forward(x, w1t, b1r, w2t, b2r, *, tile_b=DEFAULT_TILE_B):
    """x: (B, 49) float32 or bfloat16; params already prepared."""
    B = x.shape[0]
    if x.dtype not in (jnp.float32, jnp.bfloat16):
        x = x.astype(jnp.float32)
    x_bytes = jnp.dtype(x.dtype).itemsize

    # Batch tile: multiple of 8 (sublanes), sized to bound padding waste.
    tile_b = max(8, _round_up(int(tile_b), 8))
    ntiles = pl.cdiv(B, tile_b)
    tb = _round_up(pl.cdiv(B, ntiles), 8)
    nt = pl.cdiv(B, tb)

    const = lambda i: (0, 0)   # weights / biases / stats: same block every step

    logits, m, l = pl.pallas_call(
        functools.partial(_fwd_stats_kernel, batch=B),
        out_shape=(jax.ShapeDtypeStruct((B, OUT_F), jnp.float32),
                   jax.ShapeDtypeStruct((1, OUT_F), jnp.float32),
                   jax.ShapeDtypeStruct((1, OUT_F), jnp.float32)),
        grid=(nt,),
        in_specs=[
            pl.BlockSpec((tb, IN_F), lambda i: (i, 0)),
            pl.BlockSpec((IN_F, HID_F), const),
            pl.BlockSpec((1, HID_F), const),
            pl.BlockSpec((HID_F, OUT_F), const),
            pl.BlockSpec((1, OUT_F), const),
        ],
        out_specs=(
            pl.BlockSpec((tb, OUT_F), lambda i: (i, 0)),
            pl.BlockSpec((1, OUT_F), const),   # running column max (accumulator)
            pl.BlockSpec((1, OUT_F), const),   # running column sum-exp (accumulator)
        ),
        compiler_params=pltpu.CompilerParams(
            # Stats accumulate across the batch-tile axis -> must be serial.
            dimension_semantics=("arbitrary",),
            vmem_limit_bytes=_VMEM_LIMIT),
        cost_estimate=pl.CostEstimate(
            flops=2 * B * (IN_F * HID_F + HID_F * OUT_F) + 8 * B * OUT_F,
            transcendentals=B * OUT_F,
            bytes_accessed=(B * IN_F * x_bytes + 4 * B * OUT_F
                            + 4 * (IN_F * HID_F + HID_F
                                   + HID_F * OUT_F + 3 * OUT_F))),
    )(x, w1t, b1r, w2t, b2r)

    out = pl.pallas_call(
        _normalize_kernel,
        out_shape=jax.ShapeDtypeStruct((B, OUT_F), jnp.float32),
        grid=(nt,),
        in_specs=[
            pl.BlockSpec((tb, OUT_F), lambda i: (i, 0)),
            pl.BlockSpec((1, OUT_F), const),
            pl.BlockSpec((1, OUT_F), const),
        ],
        out_specs=pl.BlockSpec((tb, OUT_F), lambda i: (i, 0)),
        compiler_params=pltpu.CompilerParams(
            dimension_semantics=("parallel",),
            vmem_limit_bytes=_VMEM_LIMIT),
        cost_estimate=pl.CostEstimate(
            flops=3 * B * OUT_F,
            transcendentals=B * OUT_F,
            bytes_accessed=8 * B * OUT_F + 8 * OUT_F),
    )(logits, m, l)
    return out


def _torch_style_linear_init(key, out_features, in_features):
    """nn.Linear default init: U(-1/sqrt(fan_in), 1/sqrt(fan_in))."""
    kw, kb = jax.random.split(key)
    bound = 1.0 / jnp.sqrt(jnp.float32(in_features))
    w = jax.random.uniform(kw, (out_features, in_features), jnp.float32, -bound, bound)
    b = jax.random.uniform(kb, (out_features,), jnp.float32, -bound, bound)
    return w, b


def _reference(x, w1, b1, w2, b2):
    h = x @ w1.T + b1
    h = jnp.where(h >= 0, h, NEG_SLOPE * h)
    y = h @ w2.T + b2
    return jax.nn.softmax(y, axis=0)


if __name__ == "__main__":
    key = jax.random.PRNGKey(0)
    k_x, k_l1, k_l2 = jax.random.split(key, 3)

    w1, b1 = _torch_style_linear_init(k_l1, HID_F, IN_F)   # Linear(49, 7)
    w2, b2 = _torch_style_linear_init(k_l2, OUT_F, HID_F)  # Linear(7, 25)
    params = prepare_params(w1, b1, w2, b2)

    ok = True
    # (B=64, single tile) and (B=53, tile_b=32 -> 2 tiles, ragged last tile)
    # to exercise both the fast path and the multi-tile online-stats + masking.
    for B, tile in ((64, DEFAULT_TILE_B), (53, 32)):
        x = jax.random.normal(jax.random.fold_in(k_x, B), (B, IN_F), dtype=jnp.float32)
        out = jax.block_until_ready(transduction_forward(x, *params, tile_b=tile))
        ref = _reference(x, w1, b1, w2, b2)
        ok &= out.shape == (B, OUT_F)
        ok &= bool(jnp.max(jnp.abs(out - ref)) < 5e-4)
        ok &= bool(jnp.max(jnp.abs(jnp.sum(out, axis=0) - 1.0)) < 1e-4)

    if not ok:
        raise SystemExit("mismatch vs reference")
    print("KERNEL_OK")
</pallas_src>

<mosaic_0001>
module attributes {stable_mosaic.version = 11 : i64} {
  func.func @_normalize_kernel(%arg0: i32, %arg1: memref<64x25xf32, #tpu.memory_space<vmem>>, %arg2: memref<1x25xf32, #tpu.memory_space<vmem>>, %arg3: memref<1x25xf32, #tpu.memory_space<vmem>>, %arg4: memref<64x25xf32, #tpu.memory_space<vmem>>) attributes {dimension_semantics = [#tpu.dimension_semantics<parallel>], iteration_bounds = array<i64: 1>, scalar_prefetch = 0 : i64, scratch_operands = 0 : i64, tpu.core_type = #tpu.core_type<tc>, window_params = [{transform_indices = @transform_0, window_bounds = array<i64: 64, 25>}, {pipeline_mode = #tpu.pipeline_mode<synchronous>, transform_indices = @transform_1, window_bounds = array<i64: 1, 25>}, {pipeline_mode = #tpu.pipeline_mode<synchronous>, transform_indices = @transform_2, window_bounds = array<i64: 1, 25>}, {transform_indices = @transform_3, window_bounds = array<i64: 64, 25>}]} {
    %c0 = arith.constant 0 : index
    %c0_0 = arith.constant 0 : index
    %0 = vector.load %arg1[%c0, %c0_0] : memref<64x25xf32, #tpu.memory_space<vmem>>, vector<64x25xf32>
    %c0_1 = arith.constant 0 : index
    %c0_2 = arith.constant 0 : index
    %1 = vector.load %arg2[%c0_1, %c0_2] : memref<1x25xf32, #tpu.memory_space<vmem>>, vector<1x25xf32>
    %2 = vector.broadcast %1 : vector<1x25xf32> to vector<64x25xf32>
    %3 = arith.subf %0, %2 : vector<64x25xf32>
    %4 = math.exp %3 : vector<64x25xf32>
    %c0_3 = arith.constant 0 : index
    %c0_4 = arith.constant 0 : index
    %5 = vector.load %arg3[%c0_3, %c0_4] : memref<1x25xf32, #tpu.memory_space<vmem>>, vector<1x25xf32>
    %6 = tpu.reciprocal %5 : vector<1x25xf32> -> vector<1x25xf32>
    %7 = vector.broadcast %6 : vector<1x25xf32> to vector<64x25xf32>
    %8 = arith.mulf %4, %7 : vector<64x25xf32>
    %c0_5 = arith.constant 0 : index
    %c0_6 = arith.constant 0 : index
    %9 = vector.load %arg4[%c0_5, %c0_6] : memref<64x25xf32, #tpu.memory_space<vmem>>, vector<64x25xf32>
    tpu.vector_store %arg4[%c0_5, %c0_6], %8 {strides = array<i32>} : memref<64x25xf32, #tpu.memory_space<vmem>>, vector<64x25xf32>,
    return
  }
  func.func @transform_0(%arg0: i32) -> (i32, i32) {
    %c0_i32 = arith.constant 0 : i32
    %c0_i32_0 = arith.constant 0 : i32
    return %arg0, %c0_i32 : i32, i32
  }
  func.func @transform_1(%arg0: i32) -> (i32, i32) {
    %c0_i32 = arith.constant 0 : i32
    %c0_i32_0 = arith.constant 0 : i32
    %c0_i32_1 = arith.constant 0 : i32
    return %c0_i32, %c0_i32_0 : i32, i32
  }
  func.func @transform_2(%arg0: i32) -> (i32, i32) {
    %c0_i32 = arith.constant 0 : i32
    %c0_i32_0 = arith.constant 0 : i32
    %c0_i32_1 = arith.constant 0 : i32
    return %c0_i32, %c0_i32_0 : i32, i32
  }
  func.func @transform_3(%arg0: i32) -> (i32, i32) {
    %c0_i32 = arith.constant 0 : i32
    %c0_i32_0 = arith.constant 0 : i32
    return %arg0, %c0_i32 : i32, i32
  }
}

module attributes {stable_mosaic.version = 11 : i64} {
  func.func @_fwd_stats_kernel(%arg0: i32, %arg1: memref<64x49xf32, #tpu.memory_space<vmem>>, %arg2: memref<49x7xf32, #tpu.memory_space<vmem>>, %arg3: memref<1x7xf32, #tpu.memory_space<vmem>>, %arg4: memref<7x25xf32, #tpu.memory_space<vmem>>, %arg5: memref<1x25xf32, #tpu.memory_space<vmem>>, %arg6: memref<64x25xf32, #tpu.memory_space<vmem>>, %arg7: memref<1x25xf32, #tpu.memory_space<vmem>>, %arg8: memref<1x25xf32, #tpu.memory_space<vmem>>) attributes {dimension_semantics = [#tpu.dimension_semantics<arbitrary>], iteration_bounds = array<i64: 1>, scalar_prefetch = 0 : i64, scratch_operands = 0 : i64, tpu.core_type = #tpu.core_type<tc>, window_params = [{transform_indices = @transform_0, window_bounds = array<i64: 64, 49>}, {pipeline_mode = #tpu.pipeline_mode<synchronous>, transform_indices = @transform_1, window_bounds = array<i64: 49, 7>}, {pipeline_mode = #tpu.pipeline_mode<synchronous>, transform_indices = @transform_2, window_bounds = array<i64: 1, 7>}, {pipeline_mode = #tpu.pipeline_mode<synchronous>, transform_indices = @transform_3, window_bounds = array<i64: 7, 25>}, {pipeline_mode = #tpu.pipeline_mode<synchronous>, transform_indices = @transform_4, window_bounds = array<i64: 1, 25>}, {transform_indices = @transform_5, window_bounds = array<i64: 64, 25>}, {pipeline_mode = #tpu.pipeline_mode<synchronous>, transform_indices = @transform_6, window_bounds = array<i64: 1, 25>}, {pipeline_mode = #tpu.pipeline_mode<synchronous>, transform_indices = @transform_7, window_bounds = array<i64: 1, 25>}]} {
    %c0_i32 = arith.constant 0 : i32
    %0 = arith.cmpi eq, %arg0, %c0_i32 : i32
    %1 = arith.extui %0 : i1 to i32
    %c0_i32_0 = arith.constant 0 : i32
    %2 = arith.cmpi ne, %1, %c0_i32_0 : i32
    scf.if %2 {
      %cst_27 = arith.constant 0xFF800000 : f32
      %46 = vector.broadcast %cst_27 : f32 to vector<1x25xf32>
      %c0_28 = arith.constant 0 : index
      %c0_29 = arith.constant 0 : index
      %47 = vector.load %arg7[%c0_28, %c0_29] : memref<1x25xf32, #tpu.memory_space<vmem>>, vector<1x25xf32>
      tpu.vector_store %arg7[%c0_28, %c0_29], %46 {strides = array<i32>} : memref<1x25xf32, #tpu.memory_space<vmem>>, vector<1x25xf32>,
      %cst_30 = arith.constant 0.000000e+00 : f32
      %48 = vector.broadcast %cst_30 : f32 to vector<1x25xf32>
      %c0_31 = arith.constant 0 : index
      %c0_32 = arith.constant 0 : index
      %49 = vector.load %arg8[%c0_31, %c0_32] : memref<1x25xf32, #tpu.memory_space<vmem>>, vector<1x25xf32>
      tpu.vector_store %arg8[%c0_31, %c0_32], %48 {strides = array<i32>} : memref<1x25xf32, #tpu.memory_space<vmem>>, vector<1x25xf32>,
    } else {
    }
    %c0 = arith.constant 0 : index
    %c0_1 = arith.constant 0 : index
    %3 = vector.load %arg1[%c0, %c0_1] : memref<64x49xf32, #tpu.memory_space<vmem>>, vector<64x49xf32>
    %c0_2 = arith.constant 0 : index
    %c0_3 = arith.constant 0 : index
    %4 = vector.load %arg2[%c0_2, %c0_3] : memref<49x7xf32, #tpu.memory_space<vmem>>, vector<49x7xf32>
    %cst = arith.constant dense<0.000000e+00> : vector<64x7xf32>
    %5 = tpu.matmul %3, %4, %cst {dimension_numbers = #tpu.dot_dimension_numbers<[1], [0], [0], [1], [0, 0, 1, 1], [], []>} : vector<64x49xf32>, vector<49x7xf32>, vector<64x7xf32> -> vector<64x7xf32>
    %c0_4 = arith.constant 0 : index
    %c0_5 = arith.constant 0 : index
    %6 = vector.load %arg3[%c0_4, %c0_5] : memref<1x7xf32, #tpu.memory_space<vmem>>, vector<1x7xf32>
    %7 = vector.broadcast %6 : vector<1x7xf32> to vector<64x7xf32>
    %8 = arith.addf %5, %7 : vector<64x7xf32>
    %cst_6 = arith.constant 0.000000e+00 : f32
    %9 = vector.broadcast %cst_6 : f32 to vector<64x7xf32>
    %10 = arith.cmpf oge, %8, %9 : vector<64x7xf32>
    %cst_7 = arith.constant 0.00999999977 : f32
    %11 = vector.broadcast %cst_7 : f32 to vector<64x7xf32>
    %12 = arith.mulf %11, %8 : vector<64x7xf32>
    %13 = arith.select %10, %8, %12 : vector<64x7xi1>, vector<64x7xf32>
    %c0_8 = arith.constant 0 : index
    %c0_9 = arith.constant 0 : index
    %14 = vector.load %arg4[%c0_8, %c0_9] : memref<7x25xf32, #tpu.memory_space<vmem>>, vector<7x25xf32>
    %cst_10 = arith.constant dense<0.000000e+00> : vector<64x25xf32>
    %15 = tpu.matmul %13, %14, %cst_10 {dimension_numbers = #tpu.dot_dimension_numbers<[1], [0], [0], [1], [0, 0, 1, 1], [], []>} : vector<64x7xf32>, vector<7x25xf32>, vector<64x25xf32> -> vector<64x25xf32>
    %c0_11 = arith.constant 0 : index
    %c0_12 = arith.constant 0 : index
    %16 = vector.load %arg5[%c0_11, %c0_12] : memref<1x25xf32, #tpu.memory_space<vmem>>, vector<1x25xf32>
    %17 = vector.broadcast %16 : vector<1x25xf32> to vector<64x25xf32>
    %18 = arith.addf %15, %17 : vector<64x25xf32>
    %c0_13 = arith.constant 0 : index
    %c0_14 = arith.constant 0 : index
    %19 = vector.load %arg6[%c0_13, %c0_14] : memref<64x25xf32, #tpu.memory_space<vmem>>, vector<64x25xf32>
    tpu.vector_store %arg6[%c0_13, %c0_14], %18 {strides = array<i32>} : memref<64x25xf32, #tpu.memory_space<vmem>>, vector<64x25xf32>,
    %20 = tpu.iota {dimensions = array<i32: 0>} : vector<64x1xi32>
    %c64_i32 = arith.constant 64 : i32
    %21 = arith.muli %arg0, %c64_i32 : i32
    %22 = vector.broadcast %21 : i32 to vector<64x1xi32>
    %23 = arith.addi %22, %20 : vector<64x1xi32>
    %c64_i32_15 = arith.constant 64 : i32
    %24 = vector.broadcast %c64_i32_15 : i32 to vector<64x1xi32>
    %25 = arith.cmpi slt, %23, %24 : vector<64x1xi32>
    %cst_16 = arith.constant 0xFF800000 : f32
    %26 = vector.shape_cast %25 : vector<64x1xi1> to vector<64x1xi1>
    %27 = vector.broadcast %26 : vector<64x1xi1> to vector<64x25xi1>
    %28 = vector.broadcast %cst_16 : f32 to vector<64x25xf32>
    %29 = arith.select %27, %18, %28 : vector<64x25xi1>, vector<64x25xf32>
    %c0_17 = arith.constant 0 : index
    %c0_18 = arith.constant 0 : index
    %30 = vector.load %arg7[%c0_17, %c0_18] : memref<1x25xf32, #tpu.memory_space<vmem>>, vector<1x25xf32>
    %c0_19 = arith.constant 0 : index
    %c0_20 = arith.constant 0 : index
    %31 = vector.load %arg8[%c0_19, %c0_20] : memref<1x25xf32, #tpu.memory_space<vmem>>, vector<1x25xf32>
    %cst_21 = arith.constant dense<0xFF800000> : vector<25xf32>
    %32 = vector.multi_reduction <maximumf>, %29, %cst_21 [0] : vector<64x25xf32> to vector<25xf32>
    %33 = vector.shape_cast %32 : vector<25xf32> to vector<1x25xf32>
    %34 = arith.maximumf %30, %33 : vector<1x25xf32>
    %35 = vector.broadcast %34 : vector<1x25xf32> to vector<64x25xf32>
    %36 = arith.subf %29, %35 : vector<64x25xf32>
    %37 = math.exp %36 : vector<64x25xf32>
    %38 = arith.subf %30, %34 : vector<1x25xf32>
    %39 = math.exp %38 : vector<1x25xf32>
    %40 = arith.mulf %31, %39 : vector<1x25xf32>
    %cst_22 = arith.constant dense<0.000000e+00> : vector<25xf32>
    %41 = vector.multi_reduction <add>, %37, %cst_22 [0] : vector<64x25xf32> to vector<25xf32>
    %42 = vector.shape_cast %41 : vector<25xf32> to vector<1x25xf32>
    %43 = arith.addf %40, %42 : vector<1x25xf32>
    %c0_23 = arith.constant 0 : index
    %c0_24 = arith.constant 0 : index
    %44 = vector.load %arg7[%c0_23, %c0_24] : memref<1x25xf32, #tpu.memory_space<vmem>>, vector<1x25xf32>
    tpu.vector_store %arg7[%c0_23, %c0_24], %34 {strides = array<i32>} : memref<1x25xf32, #tpu.memory_space<vmem>>, vector<1x25xf32>,
    %c0_25 = arith.constant 0 : index
    %c0_26 = arith.constant 0 : index
    %45 = vector.load %arg8[%c0_25, %c0_26] : memref<1x25xf32, #tpu.memory_space<vmem>>, vector<1x25xf32>
    tpu.vector_store %arg8[%c0_25, %c0_26], %43 {strides = array<i32>} : memref<1x25xf32, #tpu.memory_space<vmem>>, vector<1x25xf32>,
    return
  }
  func.func @transform_0(%arg0: i32) -> (i32, i32) {
    %c0_i32 = arith.constant 0 : i32
    %c0_i32_0 = arith.constant 0 : i32
    return %arg0, %c0_i32 : i32, i32
  }
  func.func @transform_1(%arg0: i32) -> (i32, i32) {
    %c0_i32 = arith.constant 0 : i32
    %c0_i32_0 = arith.constant 0 : i32
    %c0_i32_1 = arith.constant 0 : i32
    return %c0_i32, %c0_i32_0 : i32, i32
  }
  func.func @transform_2(%arg0: i32) -> (i32, i32) {
    %c0_i32 = arith.constant 0 : i32
    %c0_i32_0 = arith.constant 0 : i32
    %c0_i32_1 = arith.constant 0 : i32
    return %c0_i32, %c0_i32_0 : i32, i32
  }
  func.func @transform_3(%arg0: i32) -> (i32, i32) {
    %c0_i32 = arith.constant 0 : i32
    %c0_i32_0 = arith.constant 0 : i32
    %c0_i32_1 = arith.constant 0 : i32
    return %c0_i32, %c0_i32_0 : i32, i32
  }
  func.func @transform_4(%arg0: i32) -> (i32, i32) {
    %c0_i32 = arith.constant 0 : i32
    %c0_i32_0 = arith.constant 0 : i32
    %c0_i32_1 = arith.constant 0 : i32
    return %c0_i32, %c0_i32_0 : i32, i32
  }
  func.func @transform_5(%arg0: i32) -> (i32, i32) {
    %c0_i32 = arith.constant 0 : i32
    %c0_i32_0 = arith.constant 0 : i32
    return %arg0, %c0_i32 : i32, i32
  }
  func.func @transform_6(%arg0: i32) -> (i32, i32) {
    %c0_i32 = arith.constant 0 : i32
    %c0_i32_0 = arith.constant 0 : i32
    %c0_i32_1 = arith.constant 0 : i32
    return %c0_i32, %c0_i32_0 : i32, i32
  }
  func.func @transform_7(%arg0: i32) -> (i32, i32) {
    %c0_i32 = arith.constant 0 : i32
    %c0_i32_0 = arith.constant 0 : i32
    %c0_i32_1 = arith.constant 0 : i32
    return %c0_i32, %c0_i32_0 : i32, i32
  }
}

</mosaic_0001>

<bundles_post_ra>
// kernel: transduction_forward.3
= control target key start
LH: loop header
LB: loop body
LE: loop exit
PB: predicated region body
PF: predicated region fallthrough
CT: control target
= control target key end

     0   :  { %v56_v14 = vlaneseq  ;;  %vm69_vm0 = vcmask 203776   ;;  %s183_s0 = inlined_call_operand.vmem [shape: f32[64,25], index: 0, kind: input, shape index: {}]   ;;  %s184_s1 = inlined_call_operand.vmem [shape: f32[1,25], index: 1, kind: input, shape index: {}]   ;;  %s185_s2 = inlined_call_operand.vmem [shape: f32[1,25], index: 2, kind: input, shape index: {}]   ;;  %s186_s3 = inlined_call_operand.vmem [shape: f32[64,25], index: 3, kind: output, shape index: {}]  }
   0x1   :  { %v14_v0 = vld [vmem:[%s183_s0] sm:$0xff]  ;;  %v15_v4 = vld [vmem:[%s183_s0 + $0x8] sm:$0xff]  ;;  %v16_v5 = vld [vmem:[%s183_s0 + $0x10] sm:$0xff] }
   0x2   :  { %v82_v1 = vld [vmem:[%s184_s1] ss:$0 sm:$0xff]  ;;  %v17_v6 = vld [vmem:[%s183_s0 + $0x18] sm:$0xff]  ;;  %v19_v11 = vld [vmem:[%s183_s0 + $0x28] sm:$0xff]  ;;  %v57_v25 = vshrl.u32 %v56_v14, 7 }
   0x3   :  { %v53_v2 = vld [vmem:[%s185_s2] sm:$0x1]  ;;  %v29_v3 = vsub.f32 %v14_v0, %v82_v1  ;;  %v30_v7 = vsub.f32 %v15_v4, %v82_v1  ;;  %v31_v8 = vsub.f32 %v16_v5, %v82_v1  ;;  %v32_v9 = vsub.f32 %v17_v6, %v82_v1  ;;  %v20_v12 = vld [vmem:[%s183_s0 + $0x30] sm:$0xff]  ;;  %v21_v17 = vld [vmem:[%s183_s0 + $0x38] sm:$0xff] }
   0x4   :  { %83 = vrcp.f32 %v53_v2  ;;  %v18_v10 = vld [vmem:[%s183_s0 + $0x20] sm:$0xff]  ;;  %v34_v16 = vsub.f32 %v19_v11, %v82_v1  ;;  %v35_v21 = vsub.f32 %v20_v12, %v82_v1  ;;  %v36_v23 = vsub.f32 %v21_v17, %v82_v1 }
   0x5   :  { %v37_v13 = vmul.f32 1.442695, %v29_v3  ;;  %v33_v15 = vsub.f32 %v18_v10, %v82_v1  ;;  %v39_v18 = vmul.f32 1.442695, %v30_v7  ;;  %v41_v19 = vmul.f32 1.442695, %v31_v8 }
   0x6   :  { %v43_v20 = vmul.f32 1.442695, %v32_v9  ;;  %v47_v24 = vmul.f32 1.442695, %v34_v16  ;;  %v49_v26 = vmul.f32 1.442695, %v35_v21 }
   0x7   :  { %85 = vpow2.f32 %v37_v13  ;;  %v45_v22 = vmul.f32 1.442695, %v33_v15  ;;  %v51_v27 = vmul.f32 1.442695, %v36_v23  ;;  %v58_v28 = vsub.s32 0, %v57_v25 }
   0x8   :  { %87 = vpow2.f32 %v39_v18 }
   0x9   :  { %89 = vpow2.f32 %v41_v19 }
   0xa   :  { %91 = vpow2.f32 %v43_v20 }
   0xb   :  { %93 = vpow2.f32 %v45_v22 }
   0xc   :  { %95 = vpow2.f32 %v47_v24 }
   0xd   :  { %97 = vpow2.f32 %v49_v26 }
   0xe   :  { %99 = vpow2.f32 %v51_v27 }
  0x11   :  { %v84_v29 = vpop.eup %83 }
  0x12   :  { %v59_v30 = vrot.slane %v84_v29, %v58_v28 }
  0x14   :  { %v86_v31 = vpop.eup %85 }
  0x15   :  { %v88_v32 = vpop.eup %87  ;;  %v61_v33 = vmul.f32 %v86_v31, %v59_v30 }
  0x16   :  { %v90_v34 = vpop.eup %89  ;;  %v62_v35 = vmul.f32 %v88_v32, %v59_v30 }
  0x17   :  { %v92_v36 = vpop.eup %91  ;;  %70 = vst.msk [vmem:[%s186_s3] sm:$0xff] %vm69_vm0, %v61_v33  ;;  %v63_v37 = vmul.f32 %v90_v34, %v59_v30 }
  0x18   :  { %v94_v38 = vpop.eup %93  ;;  %71 = vst.msk [vmem:[%s186_s3 + $0x8] sm:$0xff] %vm69_vm0, %v62_v35  ;;  %v64_v39 = vmul.f32 %v92_v36, %v59_v30 }
  0x19   :  { %v96_v40 = vpop.eup %95  ;;  %72 = vst.msk [vmem:[%s186_s3 + $0x10] sm:$0xff] %vm69_vm0, %v63_v37  ;;  %v65_v41 = vmul.f32 %v94_v38, %v59_v30 }
  0x1a   :  { %v98_v42 = vpop.eup %97  ;;  %73 = vst.msk [vmem:[%s186_s3 + $0x18] sm:$0xff] %vm69_vm0, %v64_v39  ;;  %v66_v43 = vmul.f32 %v96_v40, %v59_v30 }
  0x1b   :  { %v100_v44 = vpop.eup %99  ;;  %74 = vst.msk [vmem:[%s186_s3 + $0x20] sm:$0xff] %vm69_vm0, %v65_v41  ;;  %v67_v45 = vmul.f32 %v98_v42, %v59_v30 }
  0x1c   :  { %75 = vst.msk [vmem:[%s186_s3 + $0x28] sm:$0xff] %vm69_vm0, %v66_v43  ;;  %v68_v46 = vmul.f32 %v100_v44, %v59_v30 }
  0x1d   :  { %76 = vst.msk [vmem:[%s186_s3 + $0x30] sm:$0xff] %vm69_vm0, %v67_v45 }
  0x1e   :  { %77 = vst.msk [vmem:[%s186_s3 + $0x38] sm:$0xff] %vm69_vm0, %v68_v46 }

// kernel: transduction_forward.2
= control target key start
LH: loop header
LB: loop body
LE: loop exit
PB: predicated region body
PF: predicated region fallthrough
CT: control target
= control target key end

     0   :  { %vm77_vm0 = vcmask 1040384   ;;  %vm52_vm1 = vcmask 400384   ;;  %vm243_vm2 = vcmask 1046528   ;;  %vm218_vm3 = vcmask 56320   ;;  %s793_s1 = inlined_call_operand.vmem [shape: f32[49,7], index: 1, kind: input, shape index: {}]   ;;  %s794_s0 = inlined_call_operand.vmem [shape: f32[64,49], index: 0, kind: input, shape index: {}]   ;;  %s795_s3 = inlined_call_operand.vmem [shape: f32[7,25], index: 3, kind: input, shape index: {}]   ;;  %s796_s2 = inlined_call_operand.vmem [shape: f32[1,7], index: 2, kind: input, shape index: {}]   ;;  %s797_s6 = inlined_call_operand.vmem [shape: f32[1,25], index: 6, kind: output, shape index: {1}]   ;;  %s798_s7 = inlined_call_operand.vmem [shape: f32[1,25], index: 7, kind: output, shape index: {2}]   ;;  %s799_s4 = inlined_call_operand.vmem [shape: f32[1,25], index: 4, kind: input, shape index: {}]   ;;  %s800_s5 = inlined_call_operand.vmem [shape: f32[64,25], index: 5, kind: output, shape index: {0}]  }
   0x1   :  { %v44_v0 = vld [vmem:[%s793_s1 + $0x30] sm:$0x1]  ;;  %v43_v1 = vld [vmem:[%s793_s1 + $0x28] sm:$0xff]  ;;  %v42_v2 = vld [vmem:[%s793_s1 + $0x20] sm:$0xff]  ;;  %vm27_vm12 = vcmask 196608   ;;  %v611_v49 = vmov -inf  }
   0x2   :  { %551 = vmatprep.subr.msk.mxu0 %vm77_vm0, %v44_v0  ;;  %v30_v3 = vld [vmem:[%s794_s0] sm:$0xff]  ;;  %v41_v4 = vld [vmem:[%s793_s1 + $0x18] sm:$0xff]  ;;  %v40_v5 = vld [vmem:[%s793_s1 + $0x10] sm:$0xff]  ;;  %28 = vst.msk [vmem:[%s797_s6] sm:$0x1] %vm27_vm12, %v611_v49  ;;  %v612_v50 = vmov 0.0  }
   0x3   :  { %552 = vmatpush3.msk.msra.mxu0 %vm77_vm0, %v44_v0  ;;  %565 = vmatprep.mubr.msk.f32.mxu0 %vm52_vm1, %v30_v3  ;;  %v39_v6 = vld [vmem:[%s793_s1 + $0x8] sm:$0xff]  ;;  %v38_v7 = vld [vmem:[%s793_s1] sm:$0xff]  ;;  %v32_v9 = vld [vmem:[%s794_s0 + $0x10] sm:$0xff]  ;;  %29 = vst.msk [vmem:[%s798_s7] sm:$0x1] %vm27_vm12, %v612_v50  ;;  %vm352_vm13 = vcmask 203776  }
   0x4   :  { %553 = vmatprep.subr.mxu0 %v43_v1  ;;  %v31_v8 = vld [vmem:[%s794_s0 + $0x8] sm:$0xff]  ;;  %v33_v10 = vld [vmem:[%s794_s0 + $0x18] sm:$0xff]  ;;  %v34_v11 = vld [vmem:[%s794_s0 + $0x20] sm:$0xff] }
   0x5   :  { %554 = vmatpush3.msra.mxu0 %v43_v1  ;;  %v35_v12 = vld [vmem:[%s794_s0 + $0x28] sm:$0xff]  ;;  %v36_v13 = vld [vmem:[%s794_s0 + $0x30] sm:$0xff]  ;;  %v37_v14 = vld [vmem:[%s794_s0 + $0x38] sm:$0xff] }
   0x6   :  { %555 = vmatprep.subr.mxu0 %v42_v2  ;;  %v210_v15 = vld [vmem:[%s795_s3] sm:$0x7f] }
   0x7   :  { %556 = vmatpush3.msra.mxu0 %v42_v2  ;;  %577 = vmatprep.subr.msk.mxu1 %vm243_vm2, %v210_v15  ;;  %v507_v16 = vld [vmem:[%s796_s2] ss:$0 sm:$0xff] }
   0x8   :  { %557 = vmatprep.subr.mxu0 %v41_v4  ;;  %578 = vmatpush3.msk.msra.mxu1 %vm243_vm2, %v210_v15  ;;  %v517_v51 = vld [vmem:[%s799_s4] ss:$0 sm:$0xff] }
   0x9   :  { %558 = vmatpush3.msra.mxu0 %v41_v4 }
   0xa   :  { %559 = vmatprep.subr.mxu0 %v40_v5 }
   0xb   :  { %560 = vmatpush3.msra.mxu0 %v40_v5 }
   0xc   :  { %561 = vmatprep.subr.mxu0 %v39_v6 }
   0xd   :  { %562 = vmatpush3.msra.mxu0 %v39_v6 }
   0xe   :  { %563 = vmatprep.subr.mxu0 %v38_v7 }
   0xf   :  { %564 = vmatpush3.msra.mxu0 %v38_v7 }
  0x10   :  { %566 = vmatmul.mubr.msk.f32.vlgmr.msra.gmra.mxu0 %vm52_vm1, %v31_v8 }
  0x11   :  { %568 = vmatprep.mubr.msk.f32.mxu0 %vm52_vm1, %v32_v9 }
  0x14   :  { %569 = vmatmul.mubr.msk.f32.gmra.mxu0 %vm52_vm1, %v33_v10 }
  0x15   :  { %571 = vmatprep.mubr.msk.f32.mxu0 %vm52_vm1, %v34_v11 }
  0x18   :  { %572 = vmatmul.mubr.msk.f32.gmra.mxu0 %vm52_vm1, %v35_v12 }
  0x19   :  { %574 = vmatprep.mubr.msk.f32.mxu0 %vm52_vm1, %v36_v13 }
  0x1c   :  { %575 = vmatmul.mubr.msk.f32.gmra.mxu0 %vm52_vm1, %v37_v14 }
  0xd0   :  { %v567_v17 = vpop.f32.mrf.mxu0 }
  0xd1   :  { %v153_v18 = vadd.f32 %v567_v17, %v507_v16 }
  0xd2   :  { %v147_v19 = vpop.f32.mrf.mxu0 }
  0xd3   :  { %v148_v20 = vadd.f32 %v507_v16, %v147_v19  ;;  %v195_v21 = vmul.f32 0.01, %v153_v18  ;;  %vm187_vm4 = vcmp.ge.f32.partialorder %v153_v18, 0.0 }
  0xd4   :  { %v570_v22 = vpop.f32.mrf.mxu0 }
  0xd5   :  { %v163_v23 = vadd.f32 %v570_v22, %v507_v16  ;;  %vm186_vm5 = vcmp.ge.f32.partialorder %v148_v20, 0.0  ;;  %v194_v24 = vmul.f32 0.01, %v148_v20  ;;  %v203_v30 = vsel %vm187_vm4, %v153_v18, %v195_v21 }
  0xd6   :  { %v157_v25 = vpop.f32.mrf.mxu0  ;;  %v437_v21 = vlaneseq }
  0xd7   :  { %v158_v26 = vadd.f32 %v507_v16, %v157_v25  ;;  %v202_v27 = vsel %vm186_vm5, %v148_v20, %v194_v24  ;;  %v197_v28 = vmul.f32 0.01, %v163_v23  ;;  %vm189_vm6 = vcmp.ge.f32.partialorder %v163_v23, 0.0 }
  0xd8   :  { %v573_v29 = vpop.f32.mrf.mxu0  ;;  %579 = vmatprep.mubr.msk.f32.mxu1 %vm218_vm3, %v202_v27  ;;  %v438_v24 = vshrl.u32 %v437_v21, 7 }
  0xd9   :  { %vm188_vm7 = vcmp.ge.f32.partialorder %v158_v26, 0.0  ;;  %v196_v31 = vmul.f32 0.01, %v158_v26  ;;  %v173_v32 = vadd.f32 %v573_v29, %v507_v16  ;;  %580 = vmatmul.mubr.msk.f32.vlgmr.msra.gmra.mxu1 %vm218_vm3, %v203_v30  ;;  %v205_v38 = vsel %vm189_vm6, %v163_v23, %v197_v28 }
  0xda   :  { %v167_v33 = vpop.f32.mrf.mxu0  ;;  %v439_v28 = vsub.s32 0, %v438_v24 }
  0xdb   :  { %v168_v34 = vadd.f32 %v507_v16, %v167_v33  ;;  %v204_v35 = vsel %vm188_vm7, %v158_v26, %v196_v31  ;;  %v199_v36 = vmul.f32 0.01, %v173_v32  ;;  %vm191_vm8 = vcmp.ge.f32.partialorder %v173_v32, 0.0  ;;  %v412_v26 = vld [vmem:[%s797_s6] sm:$0x1] }
  0xdc   :  { %v576_v37 = vpop.f32.mrf.mxu0  ;;  %582 = vmatprep.mubr.msk.f32.mxu1 %vm218_vm3, %v204_v35 }
  0xdd   :  { %vm190_vm9 = vcmp.ge.f32.partialorder %v168_v34, 0.0  ;;  %v198_v39 = vmul.f32 0.01, %v168_v34  ;;  %v183_v40 = vadd.f32 %v576_v37, %v507_v16  ;;  %583 = vmatmul.mubr.msk.f32.gmra.mxu1 %vm218_vm3, %v205_v38  ;;  %v207_v45 = vsel %vm191_vm8, %v173_v32, %v199_v36 }
  0xde   :  { %v177_v41 = vpop.f32.mrf.mxu0 }
  0xdf   :  { %v178_v42 = vadd.f32 %v507_v16, %v177_v41  ;;  %v206_v43 = vsel %vm190_vm9, %v168_v34, %v198_v39  ;;  %v201_v44 = vmul.f32 0.01, %v183_v40  ;;  %vm193_vm10 = vcmp.ge.f32.partialorder %v183_v40, 0.0 }
  0xe0   :  { %585 = vmatprep.mubr.msk.f32.mxu1 %vm218_vm3, %v206_v43 }
  0xe1   :  { %vm192_vm11 = vcmp.ge.f32.partialorder %v178_v42, 0.0  ;;  %v200_v46 = vmul.f32 0.01, %v178_v42  ;;  %586 = vmatmul.mubr.msk.f32.gmra.mxu1 %vm218_vm3, %v207_v45  ;;  %v209_v48 = vsel %vm193_vm10, %v183_v40, %v201_v44 }
  0xe3   :  { %v208_v47 = vsel %vm192_vm11, %v178_v42, %v200_v46 }
  0xe4   :  { %588 = vmatprep.mubr.msk.f32.mxu1 %vm218_vm3, %v208_v47 }
  0xe5   :  { %589 = vmatmul.mubr.msk.f32.gmra.mxu1 %vm218_vm3, %v209_v48 }
 0x199   :  { %v581_v52 = vpop.f32.mrf.mxu1 }
 0x19a   :  { %v319_v53 = vadd.f32 %v581_v52, %v517_v51 }
 0x19b   :  { %v313_v54 = vpop.f32.mrf.mxu1 }
 0x19c   :  { %354 = vst.msk [vmem:[%s800_s5 + $0x8] sm:$0xff] %vm352_vm13, %v319_v53  ;;  %v314_v55 = vadd.f32 %v517_v51, %v313_v54  ;;  %v415_v9 = vsel %vm352_vm13, %v319_v53, -inf }
 0x19d   :  { %v584_v56 = vpop.f32.mrf.mxu1 }
 0x19e   :  { %353 = vst.msk [vmem:[%s800_s5] sm:$0xff] %vm352_vm13, %v314_v55  ;;  %v329_v57 = vadd.f32 %v584_v56, %v517_v51  ;;  %v414_v4 = vsel %vm352_vm13, %v314_v55, -inf }
 0x19f   :  { %v323_v58 = vpop.f32.mrf.mxu1 }
 0x1a0   :  { %356 = vst.msk [vmem:[%s800_s5 + $0x18] sm:$0xff] %vm352_vm13, %v329_v57  ;;  %v324_v59 = vadd.f32 %v517_v51, %v323_v58  ;;  %v417_v10 = vsel %vm352_vm13, %v329_v57, -inf }
 0x1a1   :  { %v587_v60 = vpop.f32.mrf.mxu1 }
 0x1a2   :  { %355 = vst.msk [vmem:[%s800_s5 + $0x10] sm:$0xff] %vm352_vm13, %v324_v59  ;;  %v339_v61 = vadd.f32 %v587_v60, %v517_v51  ;;  %v416_v11 = vsel %vm352_vm13, %v324_v59, -inf }
 0x1a3   :  { %v333_v62 = vpop.f32.mrf.mxu1 }
 0x1a4   :  { %358 = vst.msk [vmem:[%s800_s5 + $0x28] sm:$0xff] %vm352_vm13, %v339_v61  ;;  %v334_v63 = vadd.f32 %v517_v51, %v333_v62  ;;  %v420_v5 = vsel %vm352_vm13, %v339_v61, -inf }
 0x1a5   :  { %v590_v0 = vpop.f32.mrf.mxu1  ;;  %v421_v13 = vmax.f32 %v415_v9, %v420_v5 }
 0x1a6   :  { %357 = vst.msk [vmem:[%s800_s5 + $0x20] sm:$0xff] %vm352_vm13, %v334_v63  ;;  %v418_v1 = vsel %vm352_vm13, %v334_v63, -inf  ;;  %v349_v2 = vadd.f32 %v590_v0, %v517_v51 }
 0x1a7   :  { %v343_v3 = vpop.f32.mrf.mxu1  ;;  %v419_v8 = vmax.f32 %v414_v4, %v418_v1 }
 0x1a8   :  { %360 = vst.msk [vmem:[%s800_s5 + $0x38] sm:$0xff] %vm352_vm13, %v349_v2  ;;  %v424_v6 = vsel %vm352_vm13, %v349_v2, -inf  ;;  %v344_v7 = vadd.f32 %v517_v51, %v343_v3 }
 0x1a9   :  { %v425_v14 = vmax.f32 %v417_v10, %v424_v6  ;;  %v426_v16 = vmax.f32 %v419_v8, %v421_v13  ;;  %v413_v13 = vld [vmem:[%s798_s7] sm:$0x1] }
 0x1aa   :  { %359 = vst.msk [vmem:[%s800_s5 + $0x30] sm:$0xff] %vm352_vm13, %v344_v7  ;;  %v422_v12 = vsel %vm352_vm13, %v344_v7, -inf }
 0x1ab   :  { %v423_v15 = vmax.f32 %v416_v11, %v422_v12 }
 0x1ad   :  { %v427_v17 = vmax.f32 %v423_v15, %v425_v14 }
 0x1af   :  { %v428_v18 = vmax.f32 %v426_v16, %v427_v17 }
 0x1b1   :  { %v429_v19 = vrot.slane %v428_v18, 4 }
 0x1b3   :  { %v430_v20 = vmax.f32 %v428_v18, %v429_v19 }
 0x1b5   :  { %v431_v22 = vrot.slane %v430_v20, 2 }
 0x1b7   :  { %v432_v23 = vmax.f32 %v430_v20, %v431_v22 }
 0x1b9   :  { %v433_v25 = vrot.slane %v432_v23, 1 }
 0x1bb   :  { %v434_v27 = vmax.f32 %v432_v23, %v433_v25 }
 0x1bd   :  { %v435_v29 = vmax.f32 %v412_v26, %v434_v27 }
 0x1bf   :  { %v440_v30 = vrot.slane %v435_v29, %v439_v28  ;;  %493 = vst.msk [vmem:[%s797_s6] sm:$0x1] %vm27_vm12, %v435_v29 }
 0x1c1   :  { %v442_v31 = vsub.f32 %v314_v55, %v440_v30  ;;  %v443_v32 = vsub.f32 %v319_v53, %v440_v30  ;;  %v444_v33 = vsub.f32 %v324_v59, %v440_v30  ;;  %v445_v34 = vsub.f32 %v329_v57, %v440_v30 }
 0x1c2   :  { %v446_v35 = vsub.f32 %v334_v63, %v440_v30  ;;  %v447_v39 = vsub.f32 %v339_v61, %v440_v30  ;;  %v448_v41 = vsub.f32 %v344_v7, %v440_v30  ;;  %v449_v43 = vsub.f32 %v349_v2, %v440_v30 }
 0x1c3   :  { %v450_v36 = vmul.f32 1.442695, %v442_v31  ;;  %v452_v37 = vmul.f32 1.442695, %v443_v32  ;;  %v454_v38 = vmul.f32 1.442695, %v444_v33  ;;  %v466_v53 = vsub.f32 %v412_v26, %v435_v29 }
 0x1c4   :  { %v456_v40 = vmul.f32 1.442695, %v445_v34  ;;  %v458_v42 = vmul.f32 1.442695, %v446_v35  ;;  %v460_v44 = vmul.f32 1.442695, %v447_v39 }
 0x1c5   :  { %593 = vpow2.f32 %v450_v36  ;;  %v462_v45 = vmul.f32 1.442695, %v448_v41  ;;  %v464_v46 = vmul.f32 1.442695, %v449_v43  ;;  %v467_v60 = vmul.f32 1.442695, %v466_v53 }
 0x1c6   :  { %595 = vpow2.f32 %v452_v37 }
 0x1c7   :  { %597 = vpow2.f32 %v454_v38 }
 0x1c8   :  { %599 = vpow2.f32 %v456_v40 }
 0x1c9   :  { %601 = vpow2.f32 %v458_v42 }
 0x1ca   :  { %603 = vpow2.f32 %v460_v44 }
 0x1cb   :  { %605 = vpow2.f32 %v462_v45 }
 0x1cc   :  { %607 = vpow2.f32 %v464_v46 }
 0x1cd   :  { %609 = vpow2.f32 %v467_v60 }
 0x1d2   :  { %v594_v47 = vpop.eup %593 }
 0x1d3   :  { %v596_v48 = vpop.eup %595  ;;  %v470_v49 = vsel %vm352_vm13, %v594_v47, 0.0 }
 0x1d4   :  { %v598_v50 = vpop.eup %597  ;;  %v471_v51 = vsel %vm352_vm13, %v596_v48, 0.0 }
 0x1d5   :  { %v600_v52 = vpop.eup %599  ;;  %v472_v54 = vadd.f32 %v471_v51, %v470_v49  ;;  %v473_v55 = vsel %vm352_vm13, %v598_v50, 0.0 }
 0x1d6   :  { %v602_v56 = vpop.eup %601  ;;  %v475_v58 = vsel %vm352_vm13, %v600_v52, 0.0 }
 0x1d7   :  { %v474_v57 = vadd.f32 %v473_v55, %v472_v54  ;;  %v604_v59 = vpop.eup %603  ;;  %v477_v62 = vsel %vm352_vm13, %v602_v56, 0.0 }
 0x1d8   :  { %v606_v63 = vpop.eup %605  ;;  %v479_v1 = vsel %vm352_vm13, %v604_v59, 0.0 }
 0x1d9   :  { %v476_v61 = vadd.f32 %v475_v58, %v474_v57  ;;  %v608_v2 = vpop.eup %607  ;;  %v481_v4 = vsel %vm352_vm13, %v606_v63, 0.0 }
 0x1da   :  { %v483_v6 = vsel %vm352_vm13, %v608_v2, 0.0  ;;  %v610_v12 = vpop.eup %609 }
 0x1db   :  { %v478_v0 = vadd.f32 %v477_v62, %v476_v61  ;;  %v469_v15 = vmul.f32 %v610_v12, %v413_v13 }
 0x1dd   :  { %v480_v3 = vadd.f32 %v479_v1, %v478_v0 }
 0x1df   :  { %v482_v5 = vadd.f32 %v481_v4, %v480_v3 }
 0x1e1   :  { %v484_v7 = vadd.f32 %v483_v6, %v482_v5 }
 0x1e3   :  { %v485_v8 = vrot.slane %v484_v7, 4 }
 0x1e5   :  { %v486_v9 = vadd.f32 %v485_v8, %v484_v7 }
 0x1e7   :  { %v487_v10 = vrot.slane %v486_v9, 2 }
 0x1e9   :  { %v488_v11 = vadd.f32 %v487_v10, %v486_v9 }
 0x1eb   :  { %v489_v14 = vrot.slane %v488_v11, 1 }
 0x1ed   :  { %v490_v16 = vadd.f32 %v489_v14, %v488_v11 }
 0x1ef   :  { %v491_v17 = vadd.f32 %v490_v16, %v469_v15 }
 0x1f1   :  { %494 = vst.msk [vmem:[%s798_s7] sm:$0x1] %vm27_vm12, %v491_v17 }

</bundles_post_ra>
